<compile_context>
chip_gen: v5e
topology: v5e:2x2
jax: 0.10.0
libtpu: 0.0.40
codegen_flags: <defaults>
</compile_context>

<pallas_src>
import jax
import jax.numpy as jnp
from jax.experimental import pallas as pl
from jax.experimental.pallas import tpu as pltpu

N_MEL = 128            # forward() asserts mel.size(-1) == 128
HOP = 256              # samples generated per mel frame (hop_length)
AMP_MIN = 1e-5         # amp_to_db clamp floor
REF_DB = 20.0          # "- 20.0" in the forward pass
MIN_DB = -100.0        # normalize: clip((S - min_db) / -min_db, 0, 1)
# Folded affine:  clip((20*log10(x) - REF_DB - MIN_DB) / (-MIN_DB), 0, 1)
NORM_SCALE = 20.0 / (-MIN_DB)                 # = 0.2
NORM_BIAS = (-REF_DB - MIN_DB) / (-MIN_DB)    # = 0.8


def _vocoder_kernel(mel_ref, w_ref, out_ref):
    # mel_ref: (tq, 128) bf16 block of raw mel frames
    # w_ref:   (128, HOP) bf16 synthesis weight (VMEM-resident, constant block)
    # out_ref: (tq, HOP)  bf16 waveform samples for these frames
    x = jnp.abs(mel_ref[...].astype(jnp.float32))          # f32 preprocessing
    x_norm = jnp.clip(
        NORM_SCALE * jnp.log10(jnp.maximum(x, AMP_MIN)) + NORM_BIAS, 0.0, 1.0)
    # per-frame synthesis on the MXU: bf16 operands, f32 accumulation.
    y = jnp.dot(x_norm.astype(jnp.bfloat16), w_ref[...],
                preferred_element_type=jnp.float32)
    out_ref[...] = jnp.tanh(y).astype(out_ref.dtype)


def _round_up(v, m):
    return (v + m - 1) // m * m


def _num_tensorcores():
    """Best-effort: 2 TCs/chip on v7x, 1 on v5e/v6e. Falls back to 1."""
    try:
        kind = jax.devices()[0].device_kind.lower()
        if "v7" in kind:
            return 2
    except Exception:
        pass
    return 1


def _choose_tq(n_frames, tq, num_cores):
    """Frame-tile size: multiple of 8 (sublane), as large as possible.
    Single-TC chips: no cap beyond the requested tq (1 tile for small n).
    v7x: cap at ~cdiv(n, num_cores) so both TensorCores get work."""
    t = min(max(tq, 8), _round_up(n_frames, 8))
    if num_cores > 1:
        t = min(t, _round_up(max(pl.cdiv(n_frames, num_cores), 8), 8))
    return _round_up(max(t, 8), 8)


def vocoder_forward(mel, w_synth_bf16, *, tq=4096):
    """mel: [B, 1, T, 128]  ->  wav: [B, 1, T*HOP] bfloat16.

    w_synth_bf16 should already be bf16 (cast once at model-load time)."""
    B, C, T, M = mel.shape
    assert M == N_MEL, "mel.shape[-1] must be 128"
    assert C == 1

    n = B * T
    # Drop the channel dim, flatten (B, T) into one frame axis, ship as bf16.
    x = mel[:, 0, :, :].reshape(n, N_MEL).astype(jnp.bfloat16)
    w = (w_synth_bf16 if w_synth_bf16.dtype == jnp.bfloat16
         else w_synth_bf16.astype(jnp.bfloat16))

    tq_eff = _choose_tq(n, tq, _num_tensorcores())
    grid = (pl.cdiv(n, tq_eff),)   # ragged last tile handled by Pallas masking

    cost = pl.CostEstimate(
        flops=2 * n * N_MEL * HOP,
        transcendentals=n * (N_MEL + HOP),          # log10 per bin + tanh per sample
        bytes_accessed=n * N_MEL * 2 + N_MEL * HOP * 2 + n * HOP * 2,  # all bf16
    )

    out = pl.pallas_call(
        _vocoder_kernel,
        out_shape=jax.ShapeDtypeStruct((n, HOP), jnp.bfloat16),
        grid_spec=pltpu.PrefetchScalarGridSpec(
            num_scalar_prefetch=0,
            grid=grid,
            in_specs=[
                # tq mel frames, all 128 mel bins (lane-dense)
                pl.BlockSpec((tq_eff, N_MEL), lambda i: (i, 0)),
                # synthesis weight: constant block index => DMA'd once, resident
                pl.BlockSpec((N_MEL, HOP), lambda i: (0, 0)),
            ],
            out_specs=pl.BlockSpec((tq_eff, HOP), lambda i: (i, 0)),
        ),
        compiler_params=pltpu.CompilerParams(
            dimension_semantics=("parallel",)),
        cost_estimate=cost,
    )(x, w)

    # (B*T, HOP) -> [B, 1, samples] (free contiguous reshape)
    return out.reshape(B, 1, T * HOP)


def _reference_f32(mel, w_synth):
    # Pure-f32 JAX reference (no bf16 shortcuts) so the tolerance below
    # measures the true deviation introduced by the kernel's bf16 I/O + MXU.
    x = jnp.abs(mel[:, 0, :, :]).astype(jnp.float32)
    x_db = 20.0 * jnp.log10(jnp.maximum(x, AMP_MIN)) - REF_DB
    x_norm = jnp.clip((x_db - MIN_DB) / (-MIN_DB), 0.0, 1.0)
    y = jnp.einsum("btm,mh->bth", x_norm, w_synth.astype(jnp.float32),
                   preferred_element_type=jnp.float32)
    y = jnp.tanh(y)
    return y.reshape(mel.shape[0], 1, -1)


if __name__ == "__main__":
    key = jax.random.PRNGKey(0)
    k_mel, k_w = jax.random.split(key)

    B, T = 2, 16
    # non-normalized mel spectrogram: [batch, 1, t-steps, n_mel]
    mel = jax.random.normal(k_mel, (B, 1, T, N_MEL), dtype=jnp.float32) * 3.0
    # deterministic synthetic synthesis weight (stands in for the pretrained
    # generator); bf16 cast hoisted to model-load scope (done once here).
    w_synth = jax.random.normal(k_w, (N_MEL, HOP), dtype=jnp.float32) * 0.02
    w_synth_bf16 = w_synth.astype(jnp.bfloat16)

    wav = vocoder_forward(mel, w_synth_bf16)
    wav = jax.block_until_ready(wav)

    ref = _reference_f32(mel, w_synth)
    assert wav.shape == (B, 1, T * HOP), wav.shape
    max_err = float(jnp.max(jnp.abs(wav.astype(jnp.float32) - ref)))
    # bf16 input + bf16 matmul operands + bf16 output store vs f32 reference.
    assert max_err < 1e-2, max_err

    print("KERNEL_OK")
</pallas_src>

<mosaic_0001>
module attributes {stable_mosaic.version = 11 : i64} {
  func.func @_vocoder_kernel(%arg0: i32, %arg1: memref<32x128xbf16, #tpu.memory_space<vmem>>, %arg2: memref<128x256xbf16, #tpu.memory_space<vmem>>, %arg3: memref<32x256xbf16, #tpu.memory_space<vmem>>) attributes {dimension_semantics = [#tpu.dimension_semantics<parallel>], iteration_bounds = array<i64: 1>, scalar_prefetch = 0 : i64, scratch_operands = 0 : i64, tpu.core_type = #tpu.core_type<tc>, window_params = [{transform_indices = @transform_0, window_bounds = array<i64: 32, 128>}, {pipeline_mode = #tpu.pipeline_mode<synchronous>, transform_indices = @transform_1, window_bounds = array<i64: 128, 256>}, {transform_indices = @transform_2, window_bounds = array<i64: 32, 256>}]} {
    %c0 = arith.constant 0 : index
    %c0_0 = arith.constant 0 : index
    %0 = vector.load %arg1[%c0, %c0_0] : memref<32x128xbf16, #tpu.memory_space<vmem>>, vector<32x128xbf16>
    %1 = arith.extf %0 : vector<32x128xbf16> to vector<32x128xf32>
    %2 = math.absf %1 : vector<32x128xf32>
    %cst = arith.constant 9.99999974E-6 : f32
    %3 = vector.broadcast %cst : f32 to vector<32x128xf32>
    %4 = arith.maximumf %2, %3 : vector<32x128xf32>
    %5 = math.log %4 : vector<32x128xf32>
    %cst_1 = arith.constant 0.434294492 : f32
    %6 = vector.broadcast %cst_1 : f32 to vector<32x128xf32>
    %7 = arith.mulf %5, %6 : vector<32x128xf32>
    %cst_2 = arith.constant 2.000000e-01 : f32
    %8 = vector.broadcast %cst_2 : f32 to vector<32x128xf32>
    %9 = arith.mulf %8, %7 : vector<32x128xf32>
    %cst_3 = arith.constant 8.000000e-01 : f32
    %10 = vector.broadcast %cst_3 : f32 to vector<32x128xf32>
    %11 = arith.addf %9, %10 : vector<32x128xf32>
    %cst_4 = arith.constant 0.000000e+00 : f32
    %cst_5 = arith.constant 1.000000e+00 : f32
    %12 = vector.broadcast %cst_4 : f32 to vector<32x128xf32>
    %13 = arith.maximumf %12, %11 : vector<32x128xf32>
    %14 = vector.broadcast %cst_5 : f32 to vector<32x128xf32>
    %15 = arith.minimumf %14, %13 : vector<32x128xf32>
    %16 = arith.truncf %15 : vector<32x128xf32> to vector<32x128xbf16>
    %c0_6 = arith.constant 0 : index
    %c0_7 = arith.constant 0 : index
    %17 = vector.load %arg2[%c0_6, %c0_7] : memref<128x256xbf16, #tpu.memory_space<vmem>>, vector<128x256xbf16>
    %cst_8 = arith.constant dense<0.000000e+00> : vector<32x256xf32>
    %18 = tpu.matmul %16, %17, %cst_8 {dimension_numbers = #tpu.dot_dimension_numbers<[1], [0], [0], [1], [0, 0, 1, 1], [], []>} : vector<32x128xbf16>, vector<128x256xbf16>, vector<32x256xf32> -> vector<32x256xf32>
    %19 = math.tanh %18 : vector<32x256xf32>
    %20 = arith.truncf %19 : vector<32x256xf32> to vector<32x256xbf16>
    %c0_9 = arith.constant 0 : index
    %c0_10 = arith.constant 0 : index
    %21 = vector.load %arg3[%c0_9, %c0_10] : memref<32x256xbf16, #tpu.memory_space<vmem>>, vector<32x256xbf16>
    tpu.vector_store %arg3[%c0_9, %c0_10], %20 {strides = array<i32>} : memref<32x256xbf16, #tpu.memory_space<vmem>>, vector<32x256xbf16>,
    return
  }
  func.func @transform_0(%arg0: i32) -> (i32, i32) {
    %c0_i32 = arith.constant 0 : i32
    %c0_i32_0 = arith.constant 0 : i32
    return %arg0, %c0_i32 : i32, i32
  }
  func.func @transform_1(%arg0: i32) -> (i32, i32) {
    %c0_i32 = arith.constant 0 : i32
    %c0_i32_0 = arith.constant 0 : i32
    %c0_i32_1 = arith.constant 0 : i32
    return %c0_i32, %c0_i32_0 : i32, i32
  }
  func.func @transform_2(%arg0: i32) -> (i32, i32) {
    %c0_i32 = arith.constant 0 : i32
    %c0_i32_0 = arith.constant 0 : i32
    return %arg0, %c0_i32 : i32, i32
  }
}

</mosaic_0001>

<bundles_post_ra>
// kernel: tpu_custom_call.1
= control target key start
LH: loop header
LB: loop body
LE: loop exit
PB: predicated region body
PF: predicated region fallthrough
CT: control target
= control target key end

     0   :  { %7 = vsyncpa [#allocation3], 0  ;;  %s511_s0 = inlined_call_operand.hbm [shape: bf16[32,128], index: 0, kind: input, shape index: {}]   ;;  %s512_s1 = inlined_call_operand.hbm [shape: bf16[128,256], index: 1, kind: input, shape index: {}]   ;;  %s513_s2 = inlined_call_operand.hbm [shape: bf16[32,256], index: 2, kind: output, shape index: {}]  }
   0x1   :  { %8 = vsyncpa [#allocation6], 0 }
   0x2   :  { %9 = vsyncpa [#allocation4], 0  ;;  %s14_s11 = sshll.u32 %s511_s0, 4  ;;  %s474_s12 = smov [#allocation2]   ;;  %s15_s11 = int_to_ptr.hbm [resolvable:$true] %s14_s11 }
   0x3   :  { %s16_s13 = sshll.u32 %s474_s12, 4  ;;  %s27_s16 = sshll.u32 %s512_s1, 4  ;;  %s17_s13 = int_to_ptr.vmem [resolvable:$true] %s16_s13  ;;  %s28_s16 = int_to_ptr.hbm [resolvable:$true] %s27_s16 }
   0x4   :  { %s475_s17 = smov 64   ;;  %s476_s18 = smov 4  }
   0x5   :  { %22 = dma.hbm_to_vmem [thread:$0]  %s15_s11, 256, %s17_s13, [#allocation3], %s475_s17, %s475_s17, %s476_s18  }
   0x6   :  { %s477_s19 = smov [#allocation5]   ;;  %s478_s21 = smov 128  }
   0x7   :  { %s29_s20 = sshll.u32 %s477_s19, 4  ;;  %s479_s22 = smov 8   ;;  %s30_s20 = int_to_ptr.vmem [resolvable:$true] %s29_s20 }
   0x8   :  { %35 = dma.hbm_to_vmem [thread:$0]  %s28_s16, 2048, %s30_s20, [#allocation6], %s478_s21, %s478_s21, %s479_s22  }
   0x9   :  { %468 = dma.done.wait [#allocation3], 256  }
   0xa   :  { %469 = vsyncadd [#allocation3], 4294967040 }
   0xb   :  { %470 = dma.done.wait [#allocation6], 2048  }
   0xc   :  { %471 = vsyncadd [#allocation6], 4294965248  ;;  %v318_v0 = vld [vmem:[#allocation5 + $0x70] sm:$0xf]  ;;  %v339_v1 = vld [vmem:[#allocation5 + $0x74] sm:$0xf0] }
   0xd   :  { %v338_v2 = vld [vmem:[#allocation5 + $0x74] sm:$0xf]  ;;  %v319_v3 = vor.u32 %v339_v1, %v318_v0  ;;  %v320_v4 = vld [vmem:[#allocation5 + $0x78] sm:$0xf0]  ;;  %v310_v5 = vld [vmem:[#allocation5 + $0x60] sm:$0xf] }
   0xe   :  { %v337_v6 = vld [vmem:[#allocation5 + $0x64] sm:$0xf0]  ;;  %v323_v7 = vor.u32 %v338_v2, %v320_v4  ;;  %v336_v8 = vld [vmem:[#allocation5 + $0x64] sm:$0xf]  ;;  %v312_v9 = vld [vmem:[#allocation5 + $0x68] sm:$0xf0] }
   0xf   :  { %186 = vmatpush.bf16.msra.mxu0 %v319_v3  ;;  %349 = vmatpush.bf16.msra.mxu2 %v319_v3  ;;  %v311_v10 = vor.u32 %v337_v6, %v310_v5  ;;  %v315_v11 = vor.u32 %v336_v8, %v312_v9  ;;  %v302_v12 = vld [vmem:[#allocation5 + $0x50] sm:$0xf]  ;;  %v335_v13 = vld [vmem:[#allocation5 + $0x54] sm:$0xf0]  ;;  %v334_v14 = vld [vmem:[#allocation5 + $0x54] sm:$0xf] }
  0x10   :  { %205 = vmatpush.bf16.msra.mxu1 %v323_v7  ;;  %357 = vmatpush.bf16.msra.mxu3 %v323_v7  ;;  %v304_v15 = vld [vmem:[#allocation5 + $0x58] sm:$0xf0]  ;;  %v303_v16 = vor.u32 %v335_v13, %v302_v12  ;;  %v294_v18 = vld [vmem:[#allocation5 + $0x40] sm:$0xf]  ;;  %v333_v19 = vld [vmem:[#allocation5 + $0x44] sm:$0xf0] }
  0x11   :  { %v307_v17 = vor.u32 %v334_v14, %v304_v15  ;;  %v332_v20 = vld [vmem:[#allocation5 + $0x44] sm:$0xf]  ;;  %v296_v21 = vld [vmem:[#allocation5 + $0x48] sm:$0xf0]  ;;  %v341_v22 = vld [vmem:[#allocation2] sm:$0xff]   ;;  %v295_v23 = vor.u32 %v333_v19, %v294_v18  ;;  %s480_s0 = smov [#allocation7]  }
  0x12   :  { %v342_v24 = vunpack.c.l.bf16 %v341_v22  ;;  %v343_v25 = vunpack.c.h.bf16 %v341_v22  ;;  %v348_v26 = vld [vmem:[#allocation2 + $0x8] sm:$0xff]   ;;  %v299_v27 = vor.u32 %v332_v20, %v296_v21  ;;  %v286_v28 = vld [vmem:[#allocation5 + $0x30] sm:$0xf]  ;;  %v330_v30 = vld [vmem:[#allocation5 + $0x34] sm:$0xf]  ;;  %s244_s1 = sshll.u32 %s480_s0, 4  ;;  %s245_s1 = int_to_ptr.vmem [resolvable:$true] %s244_s1 }
  0x13   :  { %187 = vmatpush.bf16.msra.mxu0 %v311_v10  ;;  %350 = vmatpush.bf16.msra.mxu2 %v311_v10  ;;  %v331_v29 = vld [vmem:[#allocation5 + $0x34] sm:$0xf0]  ;;  %v346_v31 = vunpack.c.l.bf16 %v348_v26  ;;  %v347_v32 = vunpack.c.h.bf16 %v348_v26  ;;  %v288_v33 = vld [vmem:[#allocation5 + $0x38] sm:$0xf0]  ;;  %v278_v39 = vld [vmem:[#allocation5 + $0x20] sm:$0xf] }
  0x14   :  { %206 = vmatpush.bf16.msra.mxu1 %v315_v11  ;;  %358 = vmatpush.bf16.msra.mxu3 %v315_v11  ;;  %v52_v34 = vand.u32 2147483647, %v342_v24  ;;  %v53_v35 = vand.u32 2147483647, %v343_v25  ;;  %v287_v38 = vor.u32 %v331_v29, %v286_v28  ;;  %v291_v42 = vor.u32 %v330_v30, %v288_v33  ;;  %v329_v43 = vld [vmem:[#allocation5 + $0x24] sm:$0xf0] }
  0x15   :  { %v54_v36 = vand.u32 2147483647, %v346_v31  ;;  %v55_v37 = vand.u32 2147483647, %v347_v32  ;;  %v328_v46 = vld [vmem:[#allocation5 + $0x24] sm:$0xf]  ;;  %v279_v48 = vor.u32 %v329_v43, %v278_v39 }
  0x16   :  { %v56_v40 = vmax.f32 %v52_v34, 1e-05  ;;  %v57_v41 = vmax.f32 %v53_v35, 1e-05  ;;  %v280_v47 = vld [vmem:[#allocation5 + $0x28] sm:$0xf0] }
  0x17   :  { %188 = vmatpush.bf16.msra.mxu0 %v303_v16  ;;  %351 = vmatpush.bf16.msra.mxu2 %v303_v16  ;;  %v58_v44 = vmax.f32 %v54_v36, 1e-05  ;;  %v59_v45 = vmax.f32 %v55_v37, 1e-05  ;;  %v283_v49 = vor.u32 %v328_v46, %v280_v47  ;;  %v270_v50 = vld [vmem:[#allocation5 + $0x10] sm:$0xf] }
  0x18   :  { %207 = vmatpush.bf16.msra.mxu1 %v307_v17  ;;  %359 = vmatpush.bf16.msra.mxu3 %v307_v17  ;;  %372 = vlog2.f32 %v56_v40  ;;  %v327_v51 = vld [vmem:[#allocation5 + $0x14] sm:$0xf0]  ;;  %v326_v52 = vld [vmem:[#allocation5 + $0x14] sm:$0xf]  ;;  %v272_v53 = vld [vmem:[#allocation5 + $0x18] sm:$0xf0] }
  0x19   :  { %374 = vlog2.f32 %v57_v41  ;;  %v271_v55 = vor.u32 %v327_v51, %v270_v50  ;;  %v275_v57 = vor.u32 %v326_v52, %v272_v53  ;;  %v262_v58 = vld [vmem:[#allocation5] sm:$0xf]  ;;  %v325_v59 = vld [vmem:[#allocation5 + $0x4] sm:$0xf0]  ;;  %v324_v62 = vld [vmem:[#allocation5 + $0x4] sm:$0xf] }
  0x1a   :  { %376 = vlog2.f32 %v58_v44  ;;  %v264_v63 = vld [vmem:[#allocation5 + $0x8] sm:$0xf0]  ;;  %v263_v4 = vor.u32 %v325_v59, %v262_v58  ;;  %s246_s25 = sshll.u32 %s513_s2, 4  ;;  %s247_s25 = int_to_ptr.hbm [resolvable:$true] %s246_s25 }
  0x1b   :  { %189 = vmatpush.bf16.msra.mxu0 %v295_v23  ;;  %352 = vmatpush.bf16.msra.mxu2 %v295_v23  ;;  %378 = vlog2.f32 %v59_v45  ;;  %v267_v7 = vor.u32 %v324_v62, %v264_v63 }
  0x1c   :  { %208 = vmatpush.bf16.msra.mxu1 %v299_v27  ;;  %360 = vmatpush.bf16.msra.mxu3 %v299_v27 }
  0x1e   :  { %v373_v54 = vpop.eup %372 }
  0x1f   :  { %190 = vmatpush.bf16.msra.mxu0 %v287_v38  ;;  %353 = vmatpush.bf16.msra.mxu2 %v287_v38  ;;  %v375_v56 = vpop.eup %374  ;;  %v61_v60 = vmul.f32 0.6931472, %v373_v54 }
  0x20   :  { %209 = vmatpush.bf16.msra.mxu1 %v291_v42  ;;  %361 = vmatpush.bf16.msra.mxu3 %v291_v42  ;;  %v377_v61 = vpop.eup %376  ;;  %v63_v0 = vmul.f32 0.6931472, %v375_v56 }
  0x21   :  { %v379_v1 = vpop.eup %378  ;;  %v68_v2 = vmul.f32 0.4342945, %v61_v60  ;;  %v65_v3 = vmul.f32 0.6931472, %v377_v61 }
  0x22   :  { %v69_v5 = vmul.f32 0.4342945, %v63_v0  ;;  %v67_v6 = vmul.f32 0.6931472, %v379_v1 }
  0x23   :  { %191 = vmatpush.bf16.msra.mxu0 %v279_v48  ;;  %354 = vmatpush.bf16.msra.mxu2 %v279_v48  ;;  %v72_v8 = vmul.f32 0.2, %v68_v2  ;;  %v70_v9 = vmul.f32 0.4342945, %v65_v3 }
  0x24   :  { %210 = vmatpush.bf16.msra.mxu1 %v283_v49  ;;  %362 = vmatpush.bf16.msra.mxu3 %v283_v49  ;;  %v73_v10 = vmul.f32 0.2, %v69_v5  ;;  %v71_v11 = vmul.f32 0.4342945, %v67_v6 }
  0x25   :  { %v76_v12 = vadd.f32 0.8, %v72_v8  ;;  %v74_v13 = vmul.f32 0.2, %v70_v9 }
  0x26   :  { %v77_v14 = vadd.f32 0.8, %v73_v10  ;;  %v75_v15 = vmul.f32 0.2, %v71_v11 }
  0x27   :  { %192 = vmatpush.bf16.msra.mxu0 %v271_v55  ;;  %355 = vmatpush.bf16.msra.mxu2 %v271_v55  ;;  %v80_v16 = vmax.f32 %v76_v12, 0.0  ;;  %v78_v17 = vadd.f32 0.8, %v74_v13 }
  0x28   :  { %211 = vmatpush.bf16.msra.mxu1 %v275_v57  ;;  %363 = vmatpush.bf16.msra.mxu3 %v275_v57  ;;  %v81_v18 = vmax.f32 %v77_v14, 0.0  ;;  %v79_v19 = vadd.f32 0.8, %v75_v15 }
  0x29   :  { %v84_v20 = vmin.f32 %v80_v16, 1.0  ;;  %v82_v21 = vmax.f32 %v78_v17, 0.0 }
  0x2a   :  { %v85_v22 = vmin.f32 %v81_v18, 1.0  ;;  %v83_v23 = vmax.f32 %v79_v19, 0.0 }
  0x2b   :  { %193 = vmatpush.bf16.msra.mxu0 %v263_v4  ;;  %356 = vmatpush.bf16.msra.mxu2 %v263_v4  ;;  %v86_v24 = vmin.f32 %v82_v21, 1.0 }
  0x2c   :  { %212 = vmatpush.bf16.msra.mxu1 %v267_v7  ;;  %364 = vmatpush.bf16.msra.mxu3 %v267_v7  ;;  %v88_v25 = vpack.c.bf16 %v85_v22, %v84_v20  ;;  %v87_v26 = vmin.f32 %v83_v23, 1.0 }
  0x2e   :  { %194 = vmatmul.bf16.vlgmr.msra.gmra.mxu0 %v88_v25  ;;  %v89_v27 = vpack.c.bf16 %v87_v26, %v86_v24 }
  0x2f   :  { %213 = vmatmul.bf16.vlgmr.msra.gmra.mxu1 %v88_v25 }
  0x30   :  { %199 = vmatmul.bf16.vlgmr.msra.gmra.mxu2 %v89_v27  ;;  %218 = vmatmul.bf16.vlgmr.msra.gmra.mxu3 %v89_v27 }
  0xab   :  { %v195_v28 = vpop.f32.mrf.mxu0 }
  0xac   :  { %v214_v29 = vpop.f32.mrf.mxu1  ;;  %380 = vtanh.f32 %v195_v28 }
  0xad   :  { %382 = vtanh.f32 %v214_v29 }
  0xb2   :  { %v381_v30 = vpop.eup %380 }
  0xb3   :  { %v383_v31 = vpop.eup %382  ;;  %v200_v32 = vpop.f32.mrf.mxu2 }
  0xb4   :  { %v219_v33 = vpop.f32.mrf.mxu3  ;;  %v232_v34 = vpack.c.bf16 %v383_v31, %v381_v30  ;;  %384 = vtanh.f32 %v200_v32  ;;  %v197_v35 = vpop.f32.mrf.mxu0 }
  0xb5   :  { %v216_v36 = vpop.f32.mrf.mxu1  ;;  %386 = vtanh.f32 %v219_v33 }
  0xb6   :  { %236 = vst [vmem:[#allocation7] sm:$0xff] %v232_v34  ;;  %388 = vtanh.f32 %v197_v35 }
  0xb7   :  { %390 = vtanh.f32 %v216_v36 }
  0xba   :  { %v385_v37 = vpop.eup %384 }
  0xbb   :  { %v387_v38 = vpop.eup %386  ;;  %v202_v39 = vpop.f32.mrf.mxu2 }
  0xbc   :  { %v221_v40 = vpop.f32.mrf.mxu3  ;;  %v389_v41 = vpop.eup %388  ;;  %v234_v42 = vpack.c.bf16 %v387_v38, %v385_v37  ;;  %392 = vtanh.f32 %v202_v39 }
  0xbd   :  { %v391_v43 = vpop.eup %390  ;;  %394 = vtanh.f32 %v221_v40 }
  0xbe   :  { %238 = vst [vmem:[#allocation7 + $0x10] sm:$0xff] %v234_v42  ;;  %v233_v44 = vpack.c.bf16 %v391_v43, %v389_v41 }
  0xc0   :  { %237 = vst [vmem:[#allocation7 + $0x8] sm:$0xff] %v233_v44 }
  0xc2   :  { %v393_v45 = vpop.eup %392 }
  0xc3   :  { %v395_v46 = vpop.eup %394 }
  0xc4   :  { %v235_v47 = vpack.c.bf16 %v395_v46, %v393_v45 }
  0xc6   :  { %239 = vst [vmem:[#allocation7 + $0x18] sm:$0xff] %v235_v47 }
  0xc7   :  { %252 = dma.vmem_to_hbm [thread:$0]  %s245_s1, 512, %s247_s25, [#allocation4], %s478_s21, %s478_s21, %s479_s22  }
  0xc8   :  { %472 = dma.done.wait [#allocation4], 512  }
  0xc9   :  { %473 = vsyncadd [#allocation4], 4294966784 }
  0xca   :  { %257 = vsyncpa [#allocation3], 1 }
  0xcb   :  { %258 = vsyncpa [#allocation6], 1 }
  0xcc   :  { %259 = vsyncpa [#allocation4], 1 }

</bundles_post_ra>
